<compile_context>
chip_gen: v5e
topology: v5e:2x2
jax: 0.10.0
libtpu: 0.0.40
codegen_flags: <defaults>
</compile_context>

<pallas_src>
import functools

import jax
import jax.numpy as jnp
from jax.experimental import pallas as pl
from jax.experimental.pallas import tpu as pltpu


# ---------------------------------------------------------------------------
# Pallas kernel
# ---------------------------------------------------------------------------
def _two_angle_conv_kernel(x_ref, w_ref, b_ref, o_ref, acc_ref, *, nb, h):
    """x_ref  : (1, nb*(h+2), W*CIN)  bf16 — nb row-padded images stacked on sublanes
       w_ref  : (3, W*CIN, W*COUT)    bf16 — banded weight, one slab per kh tap (resident)
       b_ref  : (1, W*COUT)           f32  — bias row (bias repeated per width position)
       o_ref  : (1, nb*h, W*COUT)     f32  — the nb images' output rows
       acc_ref: (nb*h, W*COUT)        f32  — VMEM accumulator scratch."""
    hp = h + 2
    x = x_ref[0]                                            # (nb*hp, K) bf16
    for kh in range(3):                                     # kh OUTERMOST:
        # One big MXU matmul per tap — the K=W*CIN weight slab is pushed once
        # and all nb*(h+2) packed rows stream against it (M >> weight stage).
        y = jnp.dot(x, w_ref[kh], preferred_element_type=jnp.float32)
        for i in range(nb):                                 # static, unrolled
            src = i * hp + kh                               # shift-add combine
            dst = i * h
            contrib = y[src:src + h, :]
            if kh == 0:
                acc_ref[dst:dst + h, :] = contrib
            else:
                acc_ref[dst:dst + h, :] = acc_ref[dst:dst + h, :] + contrib
    # Lane-dense full-width store (unmasked vst), bias add on the f32 acc.
    o_ref[0] = (acc_ref[...] + b_ref[...]).astype(o_ref.dtype)


# ---------------------------------------------------------------------------
# Weight construction (tiny, done once in XLA)
# ---------------------------------------------------------------------------
def _expanded_weight(param):
    """PyTorch TwoAngleConv weight expansion -> (OC, IC, 4, 6, 3, 3)."""
    OC, IC = param.shape[:2]
    w6 = jnp.zeros((OC, IC, 4, 6, 3, 3), param.dtype)
    cur = param
    for a in range(4):
        w6 = w6.at[:, :, a, a:a + 3, :, :].set(cur)
        cur = jnp.rot90(cur, k=1, axes=(3, 4))              # == rotate90(., (-1, -2))
    return w6


def _banded_weights(param, bias, W):
    """Fold angle circular pad + spatial W zero pad into matmul weights.
    Returns wb (3, W*IC*4, W*OC*4) f32 and a bias row (1, W*OC*4) f32."""
    OC, IC = param.shape[:2]
    w6 = _expanded_weight(param)
    # circular angle pad 6 -> 4: padded slot ap reads input angle (ap-1) % 4
    w4 = w6[:, :, :, 1:5, :, :]
    w4 = w4.at[:, :, :, 0, :, :].add(w6[:, :, :, 5, :, :])
    w4 = w4.at[:, :, :, 3, :, :].add(w6[:, :, :, 0, :, :])
    # per-tap matmul weight wk[kh, kw, ic*4 + a_in, oc*4 + a_out]
    wk = jnp.transpose(w4, (4, 5, 1, 3, 0, 2)).reshape(3, 3, IC * 4, OC * 4)
    # band over the width dimension (also encodes the zero padding along W):
    # wb[kh, wi*CIN + cf, wo*COUT + j] = wk[kh, kw, cf, j]  iff  wi == wo+kw-1
    kw = jnp.arange(3)[:, None, None]
    wi = jnp.arange(W)[None, :, None]
    wo = jnp.arange(W)[None, None, :]
    sel = (wi == wo + kw - 1).astype(param.dtype)           # (3, W, W) 0/1
    wb = jnp.einsum('xio,kxfj->kifoj', sel, wk,
                    precision=jax.lax.Precision.HIGHEST)
    wb = wb.reshape(3, W * IC * 4, W * OC * 4)
    brow = jnp.tile(jnp.repeat(bias, 4), W).reshape(1, W * OC * 4)
    return wb, brow


# ---------------------------------------------------------------------------
# Wrapper
# ---------------------------------------------------------------------------
def _images_per_step(n, h, target_rows=128):
    """Largest divisor of n packing ~>=target_rows LHS rows per weight push,
    while keeping >= 2 grid steps (pipeline + v7x dual-TC) whenever n >= 2."""
    cap = max(1, (target_rows + h + 1) // (h + 2))
    if n >= 2:
        cap = min(cap, n // 2)
    nb = 1
    for d in range(1, n + 1):
        if n % d == 0 and d <= cap:
            nb = d
    return nb


def two_angle_conv(x, param, bias):
    """TwoAngleConv.forward (stride=1).  x: (N, C, H, W, 4) -> (N, OC, H, W, 4)."""
    N, C, H, W, A = x.shape
    assert A == 4
    OC = param.shape[0]
    CIN, COUT = C * 4, OC * 4

    nb = _images_per_step(N, H)       # images packed per grid step
    G = N // nb                       # grid steps (>= 2 whenever N >= 2)

    # Entry relayout (module boundary): (N,C,H,W,4) -> folded lane-dense
    # (N, H, W*C*4) plus 2 zero halo rows per image, then pack nb images per
    # grid step along the sublane axis (a contiguous, free reshape) and cast
    # to bf16 for the MXU.  No angle padding is ever materialized.
    xf = jnp.transpose(x, (0, 2, 3, 1, 4)).reshape(N, H, W * CIN)
    xp = jnp.pad(xf, ((0, 0), (1, 1), (0, 0)))
    xp = xp.reshape(G, nb * (H + 2), W * CIN).astype(jnp.bfloat16)

    wb, brow = _banded_weights(param, bias, W)
    wb = wb.astype(jnp.bfloat16)      # f32 accumulation happens in the kernel

    cost = pl.CostEstimate(
        flops=2 * 3 * N * (H + 2) * (W * CIN) * (W * COUT),
        transcendentals=0,
        bytes_accessed=(xp.size * xp.dtype.itemsize
                        + wb.size * wb.dtype.itemsize
                        + brow.size * brow.dtype.itemsize
                        + N * H * W * COUT * 4),
    )

    kernel = functools.partial(_two_angle_conv_kernel, nb=nb, h=H)
    out = pl.pallas_call(
        kernel,
        grid=(G,),
        in_specs=[
            # one image-group slab per step
            pl.BlockSpec((1, nb * (H + 2), W * CIN), lambda g: (g, 0, 0)),
            # constant index_maps -> weight & bias stay VMEM-resident
            pl.BlockSpec((3, W * CIN, W * COUT), lambda g: (0, 0, 0)),
            pl.BlockSpec((1, W * COUT), lambda g: (0, 0)),
        ],
        out_specs=pl.BlockSpec((1, nb * H, W * COUT), lambda g: (g, 0, 0)),
        out_shape=jax.ShapeDtypeStruct((G, nb * H, W * COUT), jnp.float32),
        scratch_shapes=[pltpu.VMEM((nb * H, W * COUT), jnp.float32)],
        compiler_params=pltpu.CompilerParams(dimension_semantics=("parallel",)),
        cost_estimate=cost,
    )(xp, wb, brow)

    # Exit relayout (module boundary): folded column idx = w*COUT + oc*4 + a.
    out = out.reshape(N, H, W, OC, 4)
    return jnp.transpose(out, (0, 3, 1, 2, 4))              # (N, OC, H, W, 4)


# ---------------------------------------------------------------------------
# Pure-JAX reference (follows the PyTorch forward literally, all f32)
# ---------------------------------------------------------------------------
def two_angle_conv_ref(x, param, bias):
    N, C, H, W, A = x.shape
    OC = param.shape[0]
    padded = jnp.concatenate([x[..., -1:], x, x[..., :1]], axis=-1)  # (...,6)
    w6 = _expanded_weight(param)
    wconv = jnp.moveaxis(w6, 2, 1).reshape(OC * 4, C * 6, 3, 3)
    inp = jnp.moveaxis(padded, -1, -3).reshape(N, C * 6, H, W)
    out = jax.lax.conv_general_dilated(
        inp, wconv, window_strides=(1, 1), padding=((1, 1), (1, 1)),
        dimension_numbers=('NCHW', 'OIHW', 'NCHW'),
        precision=jax.lax.Precision.HIGHEST)
    out = out + jnp.repeat(bias, 4)[None, :, None, None]
    return jnp.moveaxis(out.reshape(N, OC, 4, H, W), 2, -1)          # (N,OC,H,W,4)


# ---------------------------------------------------------------------------
if __name__ == "__main__":
    N, C, OC, H, W = 2, 4, 4, 16, 16
    key = jax.random.PRNGKey(0)
    kx, kp, kb = jax.random.split(key, 3)
    x = jax.random.normal(kx, (N, C, H, W, 4), jnp.float32)
    param = jax.random.normal(kp, (OC, C, 3, 3, 3), jnp.float32)
    bias = jax.random.normal(kb, (OC,), jnp.float32)

    out = jax.jit(two_angle_conv)(x, param, bias)
    jax.block_until_ready(out)
    assert out.shape == (N, OC, H, W, 4)
    assert bool(jnp.all(jnp.isfinite(out)))

    ref = two_angle_conv_ref(x, param, bias)
    rel_err = float(jnp.max(jnp.abs(out - ref)) / (jnp.max(jnp.abs(ref)) + 1e-6))
    # bf16 inputs/weights with f32 accumulation: 3e-2 gives ~10x margin over the
    # expected rounding error at K_eff=108 terms (f32 path would pass 1e-5).
    assert rel_err < 3e-2, f"kernel/reference mismatch: rel_err={rel_err}"
    print("KERNEL_OK")
</pallas_src>

<mosaic_0001>
module attributes {stable_mosaic.version = 11 : i64} {
  func.func @_two_angle_conv_kernel(%arg0: i32, %arg1: memref<1x18x256xbf16, #tpu.memory_space<vmem>>, %arg2: memref<3x256x256xbf16, #tpu.memory_space<vmem>>, %arg3: memref<1x256xf32, #tpu.memory_space<vmem>>, %arg4: memref<1x16x256xf32, #tpu.memory_space<vmem>>, %arg5: memref<16x256xf32, #tpu.memory_space<vmem>>) attributes {dimension_semantics = [#tpu.dimension_semantics<parallel>], iteration_bounds = array<i64: 2>, scalar_prefetch = 0 : i64, scratch_operands = 1 : i64, tpu.core_type = #tpu.core_type<tc>, window_params = [{transform_indices = @transform_0, window_bounds = array<i64: 1, 18, 256>}, {pipeline_mode = #tpu.pipeline_mode<synchronous>, transform_indices = @transform_1, window_bounds = array<i64: 3, 256, 256>}, {pipeline_mode = #tpu.pipeline_mode<synchronous>, transform_indices = @transform_2, window_bounds = array<i64: 1, 256>}, {transform_indices = @transform_3, window_bounds = array<i64: 1, 16, 256>}]} {
    %c0 = arith.constant 0 : index
    %c0_0 = arith.constant 0 : index
    %c0_1 = arith.constant 0 : index
    %0 = vector.load %arg1[%c0, %c0_0, %c0_1] : memref<1x18x256xbf16, #tpu.memory_space<vmem>>, vector<1x18x256xbf16>
    %1 = vector.shape_cast %0 : vector<1x18x256xbf16> to vector<18x256xbf16>
    %c0_2 = arith.constant 0 : index
    %c0_3 = arith.constant 0 : index
    %c0_4 = arith.constant 0 : index
    %2 = vector.load %arg2[%c0_2, %c0_3, %c0_4] : memref<3x256x256xbf16, #tpu.memory_space<vmem>>, vector<1x256x256xbf16>
    %3 = vector.shape_cast %2 : vector<1x256x256xbf16> to vector<256x256xbf16>
    %cst = arith.constant dense<0.000000e+00> : vector<18x256xf32>
    %4 = tpu.matmul %1, %3, %cst {dimension_numbers = #tpu.dot_dimension_numbers<[1], [0], [0], [1], [0, 0, 1, 1], [], []>} : vector<18x256xbf16>, vector<256x256xbf16>, vector<18x256xf32> -> vector<18x256xf32>
    %5 = vector.extract_strided_slice %4 {offsets = [0, 0], sizes = [16, 256], strides = [1, 1]} : vector<18x256xf32> to vector<16x256xf32>
    %c0_5 = arith.constant 0 : index
    %c0_6 = arith.constant 0 : index
    %6 = vector.load %arg5[%c0_5, %c0_6] : memref<16x256xf32, #tpu.memory_space<vmem>>, vector<16x256xf32>
    tpu.vector_store %arg5[%c0_5, %c0_6], %5 {strides = array<i32>} : memref<16x256xf32, #tpu.memory_space<vmem>>, vector<16x256xf32>,
    %c1 = arith.constant 1 : index
    %c0_7 = arith.constant 0 : index
    %c0_8 = arith.constant 0 : index
    %7 = vector.load %arg2[%c1, %c0_7, %c0_8] : memref<3x256x256xbf16, #tpu.memory_space<vmem>>, vector<1x256x256xbf16>
    %8 = vector.shape_cast %7 : vector<1x256x256xbf16> to vector<256x256xbf16>
    %cst_9 = arith.constant dense<0.000000e+00> : vector<18x256xf32>
    %9 = tpu.matmul %1, %8, %cst_9 {dimension_numbers = #tpu.dot_dimension_numbers<[1], [0], [0], [1], [0, 0, 1, 1], [], []>} : vector<18x256xbf16>, vector<256x256xbf16>, vector<18x256xf32> -> vector<18x256xf32>
    %10 = vector.extract_strided_slice %9 {offsets = [1, 0], sizes = [16, 256], strides = [1, 1]} : vector<18x256xf32> to vector<16x256xf32>
    %c0_10 = arith.constant 0 : index
    %c0_11 = arith.constant 0 : index
    %11 = vector.load %arg5[%c0_10, %c0_11] : memref<16x256xf32, #tpu.memory_space<vmem>>, vector<16x256xf32>
    %12 = arith.addf %11, %10 : vector<16x256xf32>
    %c0_12 = arith.constant 0 : index
    %c0_13 = arith.constant 0 : index
    %13 = vector.load %arg5[%c0_12, %c0_13] : memref<16x256xf32, #tpu.memory_space<vmem>>, vector<16x256xf32>
    tpu.vector_store %arg5[%c0_12, %c0_13], %12 {strides = array<i32>} : memref<16x256xf32, #tpu.memory_space<vmem>>, vector<16x256xf32>,
    %c2 = arith.constant 2 : index
    %c0_14 = arith.constant 0 : index
    %c0_15 = arith.constant 0 : index
    %14 = vector.load %arg2[%c2, %c0_14, %c0_15] : memref<3x256x256xbf16, #tpu.memory_space<vmem>>, vector<1x256x256xbf16>
    %15 = vector.shape_cast %14 : vector<1x256x256xbf16> to vector<256x256xbf16>
    %cst_16 = arith.constant dense<0.000000e+00> : vector<18x256xf32>
    %16 = tpu.matmul %1, %15, %cst_16 {dimension_numbers = #tpu.dot_dimension_numbers<[1], [0], [0], [1], [0, 0, 1, 1], [], []>} : vector<18x256xbf16>, vector<256x256xbf16>, vector<18x256xf32> -> vector<18x256xf32>
    %17 = vector.extract_strided_slice %16 {offsets = [2, 0], sizes = [16, 256], strides = [1, 1]} : vector<18x256xf32> to vector<16x256xf32>
    %c0_17 = arith.constant 0 : index
    %c0_18 = arith.constant 0 : index
    %18 = vector.load %arg5[%c0_17, %c0_18] : memref<16x256xf32, #tpu.memory_space<vmem>>, vector<16x256xf32>
    %19 = arith.addf %18, %17 : vector<16x256xf32>
    %c0_19 = arith.constant 0 : index
    %c0_20 = arith.constant 0 : index
    %20 = vector.load %arg5[%c0_19, %c0_20] : memref<16x256xf32, #tpu.memory_space<vmem>>, vector<16x256xf32>
    tpu.vector_store %arg5[%c0_19, %c0_20], %19 {strides = array<i32>} : memref<16x256xf32, #tpu.memory_space<vmem>>, vector<16x256xf32>,
    %c0_21 = arith.constant 0 : index
    %c0_22 = arith.constant 0 : index
    %21 = vector.load %arg5[%c0_21, %c0_22] : memref<16x256xf32, #tpu.memory_space<vmem>>, vector<16x256xf32>
    %c0_23 = arith.constant 0 : index
    %c0_24 = arith.constant 0 : index
    %22 = vector.load %arg3[%c0_23, %c0_24] : memref<1x256xf32, #tpu.memory_space<vmem>>, vector<1x256xf32>
    %23 = vector.broadcast %22 : vector<1x256xf32> to vector<16x256xf32>
    %24 = arith.addf %21, %23 : vector<16x256xf32>
    %c0_25 = arith.constant 0 : index
    %c0_26 = arith.constant 0 : index
    %c0_27 = arith.constant 0 : index
    %25 = vector.load %arg4[%c0_25, %c0_26, %c0_27] : memref<1x16x256xf32, #tpu.memory_space<vmem>>, vector<1x16x256xf32>
    %26 = vector.shape_cast %25 : vector<1x16x256xf32> to vector<16x256xf32>
    %27 = vector.shape_cast %24 : vector<16x256xf32> to vector<1x16x256xf32>
    tpu.vector_store %arg4[%c0_25, %c0_26, %c0_27], %27 {strides = array<i32>} : memref<1x16x256xf32, #tpu.memory_space<vmem>>, vector<1x16x256xf32>,
    return
  }
  func.func @transform_0(%arg0: i32) -> (i32, i32, i32) {
    %c0_i32 = arith.constant 0 : i32
    %c0_i32_0 = arith.constant 0 : i32
    %c0_i32_1 = arith.constant 0 : i32
    return %arg0, %c0_i32, %c0_i32_0 : i32, i32, i32
  }
  func.func @transform_1(%arg0: i32) -> (i32, i32, i32) {
    %c0_i32 = arith.constant 0 : i32
    %c0_i32_0 = arith.constant 0 : i32
    %c0_i32_1 = arith.constant 0 : i32
    %c0_i32_2 = arith.constant 0 : i32
    return %c0_i32, %c0_i32_0, %c0_i32_1 : i32, i32, i32
  }
  func.func @transform_2(%arg0: i32) -> (i32, i32) {
    %c0_i32 = arith.constant 0 : i32
    %c0_i32_0 = arith.constant 0 : i32
    %c0_i32_1 = arith.constant 0 : i32
    return %c0_i32, %c0_i32_0 : i32, i32
  }
  func.func @transform_3(%arg0: i32) -> (i32, i32, i32) {
    %c0_i32 = arith.constant 0 : i32
    %c0_i32_0 = arith.constant 0 : i32
    %c0_i32_1 = arith.constant 0 : i32
    return %arg0, %c0_i32, %c0_i32_0 : i32, i32, i32
  }
}

</mosaic_0001>

<bundles_post_ra>
// kernel: tile.5
= control target key start
LH: loop header
LB: loop body
LE: loop exit
PB: predicated region body
PF: predicated region fallthrough
CT: control target
= control target key end

     0   :  { %s37_s8 = smov 4   ;;  %s38_s9 = smov 8   ;;  %vm7_vm0 = vcmask 31744   ;;  %vm13_vm1 = vcmask 130144   ;;  %vm19_vm2 = vcmask 97344   ;;  %vm25_vm3 = vcmask 64544   ;;  %s55_s0 = inlined_call_operand.vmem [shape: f32[4,4], index: 0, kind: input, shape index: {}]   ;;  %s56_s1 = inlined_call_operand.vmem [shape: f32[16], index: 1, kind: output, shape index: {}]  }
   0x1   :  { %v4_v0 = vld [vmem:[%s55_s0] sm:$0xf]  ;;  %s36_s0 = smov 12  }
   0x2   :  { %5 = vst [vmem:[#allocation1] sm:$0xf] %v4_v0 }
   0x9   :  { %v10_v1 = vld [vmem:[#allocation1 + $0x3] sm:$0x1]   ;;  %v22_v2 = vld [vmem:[#allocation1 + $0x1] sm:$0x1]   ;;  %v16_v3 = vld [vmem:[#allocation1 + $0x2] sm:$0x1]  }
   0xa   :  { %11 = vrot.lane.b32.xlu0 %v10_v1, %s36_s0  ;;  %23 = vrot.lane.b32.xlu1 %v22_v2, %s37_s8  ;;  %v6_v4 = vld [vmem:[#allocation1] sm:$0x1]  }
   0xb   :  { %8 = vst.msk [vmem:[#allocation0] sm:$0x1] %vm7_vm0, %v6_v4  }
  0x12   :  { %17 = vrot.lane.b32.xlu0 %v16_v3, %s38_s9 }
  0x7c   :  { %v12_v5 = vpop.permute.xlu0 %11   ;;  %v24_v6 = vpop.permute.xlu1 %23  }
  0x7d   :  { %14 = vst.msk [vmem:[#allocation0] sm:$0x1] %vm13_vm1, %v12_v5  }
  0x84   :  { %v18_v7 = vpop.permute.xlu0 %17  }
  0x85   :  { %20 = vst.msk [vmem:[#allocation0] sm:$0x1] %vm19_vm2, %v18_v7  }
  0x86   :  { %26 = vst.msk [vmem:[#allocation0] sm:$0x1] %vm25_vm3, %v24_v6  }
  0x8d   :  { %v29_v8 = vld [vmem:[#allocation0] sm:$0x1] }
  0x8e   :  { %32 = vst [vmem:[%s56_s1] sm:$0x1] %v29_v8 }

// kernel: tile.6
= control target key start
LH: loop header
LB: loop body
LE: loop exit
PB: predicated region body
PF: predicated region fallthrough
CT: control target
= control target key end

     0   :  { %s28_s0 = inlined_call_operand.vmem [shape: f32[16], index: 0, kind: input, shape index: {}]   ;;  %s29_s1 = inlined_call_operand.vmem [shape: f32[16,16], index: 1, kind: output, shape index: {}]  }
   0x1   :  { %v4_v0 = vld [vmem:[%s28_s0] ss:$0 sm:$0xff] }
   0x2   :  { %5 = vst [vmem:[%s29_s1] sm:$0xff] %v4_v0 }
   0x3   :  { %8 = vst [vmem:[%s29_s1 + $0x8] sm:$0xff] %v4_v0 }

// kernel: tile.7
= control target key start
LH: loop header
LB: loop body
LE: loop exit
PB: predicated region body
PF: predicated region fallthrough
CT: control target
= control target key end

     0   :  { %s7_s6 = smov 3  ;;  %s21_s9 = smov 3  ;;  %vm4_vm0 = vcmask 130048   ;;  %vm11_vm1 = vcmask 1048448   ;;  %vm18_vm2 = vcmask 917248   ;;  %vm25_vm3 = vcmask 786048   ;;  %s129_s0 = inlined_call_operand.vmem [shape: f32[16,16], index: 0, kind: input, shape index: {}]   ;;  %s130_s1 = inlined_call_operand.vmem [shape: f32[1,256], index: 1, kind: output, shape index: {}]  }
   0x1   :  { %v67_v0 = vld [vmem:[%s129_s0 + $0x7] ss:$8 sm:%s7_s6]   ;;  %s82_s10 = smov 112   ;;  %v69_v1 = vld [vmem:[%s129_s0 + $0x5] ss:$8 sm:%s21_s9]   ;;  %s83_s13 = smov 80  }
   0x2   :  { %9 = vrot.lane.b32.xlu0 %v67_v0, %s82_s10  ;;  %23 = vrot.lane.b32.xlu1 %v69_v1, %s83_s13  ;;  %s14_s14 = smov 3  ;;  %s28_s15 = smov 3  ;;  %vm32_vm4 = vcmask 654848   ;;  %vm39_vm5 = vcmask 523648   ;;  %vm46_vm6 = vcmask 392448   ;;  %vm53_vm7 = vcmask 261248  }
   0x3   :  { %s35_s16 = smov 3  ;;  %v68_v3 = vld [vmem:[%s129_s0 + $0x6] ss:$8 sm:%s14_s14]   ;;  %s84_s21 = smov 48   ;;  %v70_v4 = vld [vmem:[%s129_s0 + $0x4] ss:$8 sm:%s28_s15]  }
   0x4   :  { %v71_v2 = vld [vmem:[%s129_s0 + $0x3] ss:$8 sm:%s35_s16]   ;;  %s42_s24 = smov 3  ;;  %s85_s25 = smov 96  }
   0x5   :  { %37 = vrot.lane.b32.xlu2 %v71_v2, %s84_s21  ;;  %s86_s26 = smov 64   ;;  %s49_s27 = smov 3  ;;  %v72_v5 = vld [vmem:[%s129_s0 + $0x2] ss:$8 sm:%s42_s24]  }
   0x6   :  { %v73_v6 = vld [vmem:[%s129_s0 + $0x1] ss:$8 sm:%s49_s27]   ;;  %s87_s3 = smov 32   ;;  %s88_s4 = smov 16  }
   0x7   :  { %s2_s5 = smov 3 }
   0x8   :  { %v3_v7 = vld [vmem:[%s129_s0] ss:$8 sm:%s2_s5]  }
   0x9   :  { %5 = vst.msk [vmem:[#allocation0] ss:$8 sm:$0x3] %vm4_vm0, %v3_v7  }
   0xa   :  { %16 = vrot.lane.b32.xlu0 %v68_v3, %s85_s25  ;;  %30 = vrot.lane.b32.xlu1 %v70_v4, %s86_s26 }
   0xd   :  { %44 = vrot.lane.b32.xlu2 %v72_v5, %s87_s3 }
  0x12   :  { %51 = vrot.lane.b32.xlu0 %v73_v6, %s88_s4 }
  0x5f   :  { %v38_v8 = vpop.permute.xlu2 %37  }
  0x67   :  { %v45_v9 = vpop.permute.xlu2 %44  }
  0x74   :  { %v10_v10 = vpop.permute.xlu0 %9   ;;  %v24_v11 = vpop.permute.xlu1 %23  }
  0x75   :  { %12 = vst.msk [vmem:[#allocation0] ss:$8 sm:$0x3] %vm11_vm1, %v10_v10  }
  0x7c   :  { %v17_v12 = vpop.permute.xlu0 %16   ;;  %v31_v13 = vpop.permute.xlu1 %30  }
  0x7d   :  { %19 = vst.msk [vmem:[#allocation0] ss:$8 sm:$0x3] %vm18_vm2, %v17_v12  }
  0x7e   :  { %26 = vst.msk [vmem:[#allocation0] ss:$8 sm:$0x3] %vm25_vm3, %v24_v11  }
  0x7f   :  { %33 = vst.msk [vmem:[#allocation0] ss:$8 sm:$0x3] %vm32_vm4, %v31_v13  }
  0x80   :  { %40 = vst.msk [vmem:[#allocation0] ss:$8 sm:$0x3] %vm39_vm5, %v38_v8  }
  0x81   :  { %47 = vst.msk [vmem:[#allocation0] ss:$8 sm:$0x3] %vm46_vm6, %v45_v9  }
  0x84   :  { %v52_v14 = vpop.permute.xlu0 %51  }
  0x85   :  { %54 = vst.msk [vmem:[#allocation0] ss:$8 sm:$0x3] %vm53_vm7, %v52_v14  }
  0x8c   :  { %v57_v15 = vld [vmem:[#allocation0] sm:$0x1]  ;;  %v62_v16 = vld [vmem:[#allocation0 + $0x8] sm:$0x1] }
  0x8d   :  { %60 = vst [vmem:[%s130_s1] sm:$0x1] %v57_v15 }
  0x8e   :  { %74 = vst [vmem:[%s130_s1 + $0x1] sm:$0x1] %v62_v16 }

// kernel: two_angle_conv.1
= control target key start
LH: loop header
LB: loop body
LE: loop exit
PB: predicated region body
PF: predicated region fallthrough
CT: control target
= control target key end

     0   :  { %s1726_s12 = smov 0   ;;  %s2392_s0 = inlined_call_operand.vmem [shape: bf16[2,18,256], index: 0, kind: input, shape index: {}]   ;;  %s2393_s1 = inlined_call_operand.vmem [shape: bf16[3,256,256], index: 1, kind: input, shape index: {}]   ;;  %s2394_s2 = inlined_call_operand.vmem [shape: f32[1,256], index: 2, kind: input, shape index: {}]   ;;  %s2395_s3 = inlined_call_operand.vmem [shape: f32[2,16,256], index: 3, kind: output, shape index: {}]  }
   0x1 LB: > { %s1124_s13 = sadd.s32 4294967295, %s1704_s12   ;;  %p1128_p0 = scmp.ge.s32.totalorder %s1704_s12, 1  ;;  %s1704_s12 = sphi %s1726_s12, %s13_s12  }
   0x2   : > { %p137_p1 = scmp.lt.s32.totalorder %s1704_s12, 3 }
   0x4   : > { %p138_p2 = pnand %p1128_p0, %p137_p1 }
   0x5   : > { %p161_p3 = scmp.lt.s32.totalorder (!%p138_p2), %s1124_s13, 1 }
   0x6   : > { %141 = sbr.rel (%p138_p2) target bundleno = 271 (0x10f), region = 32 }
   0xb   : > { %v1198_v0 = vld [vmem:[%s2393_s1 + $0x70] sm:$0xf]  ;;  %v1608_v1 = vld [vmem:[%s2393_s1 + $0x74] sm:$0xf0]  ;;  %v1607_v5 = vld [vmem:[%s2393_s1 + $0x74] sm:$0xf] }
   0xc   : > { %v1262_v2 = vld [vmem:[%s2393_s1 + $0xf0] sm:$0xf]  ;;  %v1199_v3 = vor.u32 %v1608_v1, %v1198_v0  ;;  %v1624_v4 = vld [vmem:[%s2393_s1 + $0xf4] sm:$0xf0]  ;;  %v1200_v6 = vld [vmem:[%s2393_s1 + $0x78] sm:$0xf0] }
   0xd   : > { %v1263_v7 = vor.u32 %v1624_v4, %v1262_v2  ;;  %v1203_v8 = vor.u32 %v1607_v5, %v1200_v6  ;;  %v1623_v9 = vld [vmem:[%s2393_s1 + $0xf4] sm:$0xf]  ;;  %v1264_v10 = vld [vmem:[%s2393_s1 + $0xf8] sm:$0xf0]  ;;  %v1190_v11 = vld [vmem:[%s2393_s1 + $0x60] sm:$0xf] }
   0xe   : > { %383 = vmatpush.bf16.msra.mxu0 %v1199_v3  ;;  %v1267_v12 = vor.u32 %v1623_v9, %v1264_v10  ;;  %v1606_v13 = vld [vmem:[%s2393_s1 + $0x64] sm:$0xf0]  ;;  %v1254_v14 = vld [vmem:[%s2393_s1 + $0xe0] sm:$0xf]  ;;  %v1605_v18 = vld [vmem:[%s2393_s1 + $0x64] sm:$0xf] }
   0xf   : > { %v1622_v15 = vld [vmem:[%s2393_s1 + $0xe4] sm:$0xf0]  ;;  %400 = vmatpush.bf16.msra.mxu1 %v1263_v7  ;;  %417 = vmatpush.bf16.msra.mxu2 %v1203_v8  ;;  %v1191_v16 = vor.u32 %v1606_v13, %v1190_v11  ;;  %v1192_v19 = vld [vmem:[%s2393_s1 + $0x68] sm:$0xf0]  ;;  %v1621_v20 = vld [vmem:[%s2393_s1 + $0xe4] sm:$0xf] }
  0x10   : > { %v1255_v17 = vor.u32 %v1622_v15, %v1254_v14  ;;  %434 = vmatpush.bf16.msra.mxu3 %v1267_v12  ;;  %v1195_v21 = vor.u32 %v1605_v18, %v1192_v19  ;;  %v1256_v22 = vld [vmem:[%s2393_s1 + $0xe8] sm:$0xf0]  ;;  %v1182_v23 = vld [vmem:[%s2393_s1 + $0x50] sm:$0xf]  ;;  %v1604_v24 = vld [vmem:[%s2393_s1 + $0x54] sm:$0xf0] }
  0x11   : > { %v1259_v25 = vor.u32 %v1621_v20, %v1256_v22  ;;  %v1246_v26 = vld [vmem:[%s2393_s1 + $0xd0] sm:$0xf]  ;;  %v1620_v27 = vld [vmem:[%s2393_s1 + $0xd4] sm:$0xf0]  ;;  %v1603_v28 = vld [vmem:[%s2393_s1 + $0x54] sm:$0xf]  ;;  %v1183_v29 = vor.u32 %v1604_v24, %v1182_v23 }
  0x12   : > { %384 = vmatpush.bf16.msra.mxu0 %v1191_v16  ;;  %v1184_v30 = vld [vmem:[%s2393_s1 + $0x58] sm:$0xf0]  ;;  %v1619_v31 = vld [vmem:[%s2393_s1 + $0xd4] sm:$0xf]  ;;  %v1247_v33 = vor.u32 %v1620_v27, %v1246_v26  ;;  %v1174_v35 = vld [vmem:[%s2393_s1 + $0x40] sm:$0xf] }
  0x13   : > { %v1248_v32 = vld [vmem:[%s2393_s1 + $0xd8] sm:$0xf0]  ;;  %401 = vmatpush.bf16.msra.mxu1 %v1255_v17  ;;  %418 = vmatpush.bf16.msra.mxu2 %v1195_v21  ;;  %v1187_v34 = vor.u32 %v1603_v28, %v1184_v30  ;;  %v1602_v36 = vld [vmem:[%s2393_s1 + $0x44] sm:$0xf0]  ;;  %v1238_v37 = vld [vmem:[%s2393_s1 + $0xc0] sm:$0xf] }
  0x14   : > { %435 = vmatpush.bf16.msra.mxu3 %v1259_v25  ;;  %v1251_v38 = vor.u32 %v1619_v31, %v1248_v32  ;;  %v1618_v39 = vld [vmem:[%s2393_s1 + $0xc4] sm:$0xf0]  ;;  %v1601_v40 = vld [vmem:[%s2393_s1 + $0x44] sm:$0xf]  ;;  %v1176_v41 = vld [vmem:[%s2393_s1 + $0x48] sm:$0xf0]  ;;  %v1175_v44 = vor.u32 %v1602_v36, %v1174_v35 }
  0x15   : > { %v1617_v42 = vld [vmem:[%s2393_s1 + $0xc4] sm:$0xf]  ;;  %v1240_v43 = vld [vmem:[%s2393_s1 + $0xc8] sm:$0xf0]  ;;  %v1239_v45 = vor.u32 %v1618_v39, %v1238_v37  ;;  %v1179_v46 = vor.u32 %v1601_v40, %v1176_v41  ;;  %v1166_v47 = vld [vmem:[%s2393_s1 + $0x30] sm:$0xf] }
  0x16   : > { %385 = vmatpush.bf16.msra.mxu0 %v1183_v29  ;;  %v1600_v48 = vld [vmem:[%s2393_s1 + $0x34] sm:$0xf0]  ;;  %v1230_v49 = vld [vmem:[%s2393_s1 + $0xb0] sm:$0xf]  ;;  %v1243_v50 = vor.u32 %v1617_v42, %v1240_v43  ;;  %v1599_v52 = vld [vmem:[%s2393_s1 + $0x34] sm:$0xf] }
  0x17   : > { %402 = vmatpush.bf16.msra.mxu1 %v1247_v33  ;;  %419 = vmatpush.bf16.msra.mxu2 %v1187_v34  ;;  %v1616_v51 = vld [vmem:[%s2393_s1 + $0xb4] sm:$0xf0]  ;;  %v1168_v53 = vld [vmem:[%s2393_s1 + $0x38] sm:$0xf0]  ;;  %v1615_v54 = vld [vmem:[%s2393_s1 + $0xb4] sm:$0xf]  ;;  %v1167_v56 = vor.u32 %v1600_v48, %v1166_v47 }
  0x18   : > { %436 = vmatpush.bf16.msra.mxu3 %v1251_v38  ;;  %v1232_v55 = vld [vmem:[%s2393_s1 + $0xb8] sm:$0xf0]  ;;  %v1231_v57 = vor.u32 %v1616_v51, %v1230_v49  ;;  %v1171_v58 = vor.u32 %v1599_v52, %v1168_v53  ;;  %v1158_v59 = vld [vmem:[%s2393_s1 + $0x20] sm:$0xf]  ;;  %v1598_v60 = vld [vmem:[%s2393_s1 + $0x24] sm:$0xf0] }
  0x19   : > { %v1222_v61 = vld [vmem:[%s2393_s1 + $0xa0] sm:$0xf]  ;;  %v1235_v62 = vor.u32 %v1615_v54, %v1232_v55  ;;  %v1614_v63 = vld [vmem:[%s2393_s1 + $0xa4] sm:$0xf0]  ;;  %v1597_v0 = vld [vmem:[%s2393_s1 + $0x24] sm:$0xf]  ;;  %v1159_v4 = vor.u32 %v1598_v60, %v1158_v59 }
  0x1a   : > { %386 = vmatpush.bf16.msra.mxu0 %v1175_v44  ;;  %v1160_v1 = vld [vmem:[%s2393_s1 + $0x28] sm:$0xf0]  ;;  %v1613_v2 = vld [vmem:[%s2393_s1 + $0xa4] sm:$0xf]  ;;  %v1150_v5 = vld [vmem:[%s2393_s1 + $0x10] sm:$0xf]  ;;  %v1223_v6 = vor.u32 %v1614_v63, %v1222_v61 }
  0x1b   : > { %403 = vmatpush.bf16.msra.mxu1 %v1239_v45  ;;  %420 = vmatpush.bf16.msra.mxu2 %v1179_v46  ;;  %v1224_v3 = vld [vmem:[%s2393_s1 + $0xa8] sm:$0xf0]  ;;  %v1163_v7 = vor.u32 %v1597_v0, %v1160_v1  ;;  %v1596_v8 = vld [vmem:[%s2393_s1 + $0x14] sm:$0xf0]  ;;  %v1214_v9 = vld [vmem:[%s2393_s1 + $0x90] sm:$0xf] }
  0x1c   : > { %437 = vmatpush.bf16.msra.mxu3 %v1243_v50  ;;  %v1612_v10 = vld [vmem:[%s2393_s1 + $0x94] sm:$0xf0]  ;;  %v1227_v11 = vor.u32 %v1613_v2, %v1224_v3  ;;  %v1595_v12 = vld [vmem:[%s2393_s1 + $0x14] sm:$0xf]  ;;  %v1152_v13 = vld [vmem:[%s2393_s1 + $0x18] sm:$0xf0]  ;;  %v1151_v16 = vor.u32 %v1596_v8, %v1150_v5 }
  0x1d   : > { %v1611_v14 = vld [vmem:[%s2393_s1 + $0x94] sm:$0xf]  ;;  %v1216_v15 = vld [vmem:[%s2393_s1 + $0x98] sm:$0xf0]  ;;  %v1142_v17 = vld [vmem:[%s2393_s1] sm:$0xf]  ;;  %v1215_v19 = vor.u32 %v1612_v10, %v1214_v9  ;;  %v1155_v20 = vor.u32 %v1595_v12, %v1152_v13 }
  0x1e   : > { %387 = vmatpush.bf16.msra.mxu0 %v1167_v56  ;;  %v1594_v18 = vld [vmem:[%s2393_s1 + $0x4] sm:$0xf0]  ;;  %s2397_s13 = smov (!%p161_p3, %s1124_s13), 1  ;;  %v1206_v21 = vld [vmem:[%s2393_s1 + $0x80] sm:$0xf]  ;;  %v1219_v24 = vor.u32 %v1611_v14, %v1216_v15  ;;  %vm730_vm0 = vcmask 1046528  }
  0x1f   : > { %404 = vmatpush.bf16.msra.mxu1 %v1231_v57  ;;  %421 = vmatpush.bf16.msra.mxu2 %v1171_v58  ;;  %v1610_v22 = vld [vmem:[%s2393_s1 + $0x84] sm:$0xf0]  ;;  %v1593_v23 = vld [vmem:[%s2393_s1 + $0x4] sm:$0xf]  ;;  %v1144_v25 = vld [vmem:[%s2393_s1 + $0x8] sm:$0xf0]  ;;  %v1143_v30 = vor.u32 %v1594_v18, %v1142_v17 }
  0x20   : > { %438 = vmatpush.bf16.msra.mxu3 %v1235_v62  ;;  %v1609_v26 = vld [vmem:[%s2393_s1 + $0x84] sm:$0xf]  ;;  %s1689_s15 = smul.u32 24, %s2397_s13  ;;  %v1208_v27 = vld [vmem:[%s2393_s1 + $0x88] sm:$0xf0]  ;;  %v1207_v34 = vor.u32 %v1610_v22, %v1206_v21  ;;  %v1147_v35 = vor.u32 %v1593_v23, %v1144_v25  ;;  %vm1028_vm1 = vcmask 1045504  }
  0x21   : > { %v1639_v28 = vld [vmem:[%s2393_s1 + $0x174] sm:$0xf]  ;;  %v1360_v29 = vld [vmem:[%s2393_s1 + $0x178] sm:$0xf0]  ;;  %v1358_v33 = vld [vmem:[%s2393_s1 + $0x170] sm:$0xf]  ;;  %v1211_v39 = vor.u32 %v1609_v26, %v1208_v27 }
  0x22   : > { %388 = vmatpush.bf16.msra.mxu0 %v1159_v4  ;;  %s1942_s24 = scalar_lea.vmem %s2392_s0, %s1689_s15  ;;  %v1655_v31 = vld [vmem:[%s2393_s1 + $0x1f4] sm:$0xf]  ;;  %v1424_v32 = vld [vmem:[%s2393_s1 + $0x1f8] sm:$0xf0]  ;;  %v1363_v41 = vor.u32 %v1639_v28, %v1360_v29  ;;  %v1640_v42 = vld [vmem:[%s2393_s1 + $0x174] sm:$0xf0] }
  0x23   : > { %405 = vmatpush.bf16.msra.mxu1 %v1223_v6  ;;  %422 = vmatpush.bf16.msra.mxu2 %v1163_v7  ;;  %v1134_v36 = vld [vmem:[%s1942_s24] sm:$0xf]  ;;  %v1592_v37 = vld [vmem:[%s1942_s24 + $0x4] sm:$0xf0]  ;;  %v1591_v38 = vld [vmem:[%s1942_s24 + $0x4] sm:$0xf]  ;;  %v1427_v45 = vor.u32 %v1655_v31, %v1424_v32  ;;  %v1359_v52 = vor.u32 %v1640_v42, %v1358_v33 }
  0x24   : > { %439 = vmatpush.bf16.msra.mxu3 %v1227_v11  ;;  %v1136_v40 = vld [vmem:[%s1942_s24 + $0x8] sm:$0xf0]  ;;  %v1422_v43 = vld [vmem:[%s2393_s1 + $0x1f0] sm:$0xf]  ;;  %v1963_v44 = vor.u32 %v1592_v37, %v1134_v36  ;;  %v1656_v46 = vld [vmem:[%s2393_s1 + $0x1f4] sm:$0xf0] }
  0x25   : > { %v1637_v47 = vld [vmem:[%s2393_s1 + $0x164] sm:$0xf]  ;;  %v1352_v48 = vld [vmem:[%s2393_s1 + $0x168] sm:$0xf0]  ;;  %v1974_v49 = vor.u32 %v1591_v38, %v1136_v40  ;;  %v1423_v53 = vor.u32 %v1656_v46, %v1422_v43  ;;  %v1350_v55 = vld [vmem:[%s2393_s1 + $0x160] sm:$0xf] }
  0x26   : > { %389 = vmatpush.bf16.msra.mxu0 %v1151_v16  ;;  %v1653_v50 = vld [vmem:[%s2393_s1 + $0x1e4] sm:$0xf]  ;;  %v1416_v51 = vld [vmem:[%s2393_s1 + $0x1e8] sm:$0xf0]  ;;  %v1355_v54 = vor.u32 %v1637_v47, %v1352_v48  ;;  %v1638_v56 = vld [vmem:[%s2393_s1 + $0x164] sm:$0xf0] }
  0x27   : > { %406 = vmatpush.bf16.msra.mxu1 %v1215_v19  ;;  %423 = vmatpush.bf16.msra.mxu2 %v1155_v20  ;;  %v1414_v57 = vld [vmem:[%s2393_s1 + $0x1e0] sm:$0xf]  ;;  %v1419_v58 = vor.u32 %v1653_v50, %v1416_v51  ;;  %v1654_v59 = vld [vmem:[%s2393_s1 + $0x1e4] sm:$0xf0]  ;;  %v1635_v60 = vld [vmem:[%s2393_s1 + $0x154] sm:$0xf]  ;;  %v1351_v0 = vor.u32 %v1638_v56, %v1350_v55 }
  0x28   : > { %440 = vmatpush.bf16.msra.mxu3 %v1219_v24  ;;  %v1344_v61 = vld [vmem:[%s2393_s1 + $0x158] sm:$0xf0]  ;;  %v1651_v62 = vld [vmem:[%s2393_s1 + $0x1d4] sm:$0xf]  ;;  %v1415_v1 = vor.u32 %v1654_v59, %v1414_v57  ;;  %v1342_v3 = vld [vmem:[%s2393_s1 + $0x150] sm:$0xf] }
  0x29   : > { %v1408_v63 = vld [vmem:[%s2393_s1 + $0x1d8] sm:$0xf0]  ;;  %v1347_v2 = vor.u32 %v1635_v60, %v1344_v61  ;;  %v1636_v4 = vld [vmem:[%s2393_s1 + $0x154] sm:$0xf0]  ;;  %v1406_v5 = vld [vmem:[%s2393_s1 + $0x1d0] sm:$0xf] }
  0x2a   : > { %390 = vmatpush.bf16.msra.mxu0 %v1143_v30  ;;  %v1411_v6 = vor.u32 %v1651_v62, %v1408_v63  ;;  %v1652_v7 = vld [vmem:[%s2393_s1 + $0x1d4] sm:$0xf0]  ;;  %v1633_v8 = vld [vmem:[%s2393_s1 + $0x144] sm:$0xf]  ;;  %v1336_v9 = vld [vmem:[%s2393_s1 + $0x148] sm:$0xf0]  ;;  %v1343_v13 = vor.u32 %v1636_v4, %v1342_v3 }
  0x2b   : > { %407 = vmatpush.bf16.msra.mxu1 %v1207_v34  ;;  %424 = vmatpush.bf16.msra.mxu2 %v1147_v35  ;;  %v1649_v10 = vld [vmem:[%s2393_s1 + $0x1c4] sm:$0xf]  ;;  %v1400_v11 = vld [vmem:[%s2393_s1 + $0x1c8] sm:$0xf0]  ;;  %v173_v12 = vld [vmem:[%s1942_s24 + $0x10] sm:$0x11]  ;;  %v1407_v14 = vor.u32 %v1652_v7, %v1406_v5  ;;  %v1339_v15 = vor.u32 %v1633_v8, %v1336_v9 }
  0x2c   : > { %441 = vmatpush.bf16.msra.mxu3 %v1211_v39  ;;  %v1334_v16 = vld [vmem:[%s2393_s1 + $0x140] sm:$0xf]  ;;  %v1634_v17 = vld [vmem:[%s2393_s1 + $0x144] sm:$0xf0]  ;;  %v1403_v19 = vor.u32 %v1649_v10, %v1400_v11  ;;  %v213_v21 = vunpack.c.l.b16 %v173_v12  ;;  %v1631_v22 = vld [vmem:[%s2393_s1 + $0x134] sm:$0xf]  ;;  %v214_v24 = vunpack.c.h.b16 %v173_v12 }
  0x2d   : > { %391 = vmatmul.bf16.vlgmr.msra.gmra.mxu0 %v1963_v44  ;;  %v1398_v18 = vld [vmem:[%s2393_s1 + $0x1c0] sm:$0xf]  ;;  %v1650_v20 = vld [vmem:[%s2393_s1 + $0x1c4] sm:$0xf0]  ;;  %v1328_v23 = vld [vmem:[%s2393_s1 + $0x138] sm:$0xf0]  ;;  %v1335_v27 = vor.u32 %v1634_v17, %v1334_v16 }
  0x2e   : > { %408 = vmatmul.bf16.vlgmr.msra.gmra.mxu1 %v1974_v49  ;;  %425 = vmatmul.bf16.vlgmr.msra.gmra.mxu2 %v1963_v44  ;;  %v1647_v25 = vld [vmem:[%s2393_s1 + $0x1b4] sm:$0xf]  ;;  %v1392_v26 = vld [vmem:[%s2393_s1 + $0x1b8] sm:$0xf0]  ;;  %v1399_v28 = vor.u32 %v1650_v20, %v1398_v18  ;;  %v1331_v29 = vor.u32 %v1631_v22, %v1328_v23  ;;  %v1326_v30 = vld [vmem:[%s2393_s1 + $0x130] sm:$0xf]  ;;  %v2068_v33 = vpack.c.b16 %v213_v21, %v213_v21 }
  0x2f   : > { %684 = vmatpush.bf16.msrb.mxu2 %v1363_v41  ;;  %442 = vmatmul.bf16.vlgmr.msra.gmra.mxu3 %v1974_v49  ;;  %v1632_v31 = vld [vmem:[%s2393_s1 + $0x134] sm:$0xf0]  ;;  %v1390_v32 = vld [vmem:[%s2393_s1 + $0x1b0] sm:$0xf]  ;;  %v1395_v34 = vor.u32 %v1647_v25, %v1392_v26  ;;  %v1629_v36 = vld [vmem:[%s2393_s1 + $0x124] sm:$0xf]  ;;  %v2079_v38 = vpack.c.b16 %v214_v24, %v214_v24 }
  0x30   : > { %702 = vmatpush.bf16.msrb.mxu3 %v1427_v45  ;;  %648 = vmatpush.bf16.msrb.mxu0 %v1359_v52  ;;  %v1648_v35 = vld [vmem:[%s2393_s1 + $0x1b4] sm:$0xf0]  ;;  %v1320_v37 = vld [vmem:[%s2393_s1 + $0x128] sm:$0xf0]  ;;  %v1645_v39 = vld [vmem:[%s2393_s1 + $0x1a4] sm:$0xf]  ;;  %v1327_v41 = vor.u32 %v1632_v31, %v1326_v30 }
  0x31   : > { %666 = vmatpush.bf16.msrb.mxu1 %v1423_v53  ;;  %v1384_v40 = vld [vmem:[%s2393_s1 + $0x1a8] sm:$0xf0]  ;;  %v1391_v42 = vor.u32 %v1648_v35, %v1390_v32  ;;  %v1323_v43 = vor.u32 %v1629_v36, %v1320_v37  ;;  %v1318_v45 = vld [vmem:[%s2393_s1 + $0x120] sm:$0xf]  ;;  %v1630_v46 = vld [vmem:[%s2393_s1 + $0x124] sm:$0xf0] }
  0x32   : > { %v1382_v47 = vld [vmem:[%s2393_s1 + $0x1a0] sm:$0xf]  ;;  %v1387_v48 = vor.u32 %v1645_v39, %v1384_v40  ;;  %v1646_v50 = vld [vmem:[%s2393_s1 + $0x1a4] sm:$0xf0]  ;;  %v1627_v51 = vld [vmem:[%s2393_s1 + $0x114] sm:$0xf]  ;;  %v1319_v55 = vor.u32 %v1630_v46, %v1318_v45 }
  0x33   : > { %685 = vmatpush.bf16.msrb.mxu2 %v1355_v54  ;;  %v1312_v52 = vld [vmem:[%s2393_s1 + $0x118] sm:$0xf0]  ;;  %v1643_v53 = vld [vmem:[%s2393_s1 + $0x194] sm:$0xf]  ;;  %v1310_v56 = vld [vmem:[%s2393_s1 + $0x110] sm:$0xf]  ;;  %v1383_v57 = vor.u32 %v1646_v50, %v1382_v47 }
  0x34   : > { %703 = vmatpush.bf16.msrb.mxu3 %v1419_v58  ;;  %649 = vmatpush.bf16.msrb.mxu0 %v1351_v0  ;;  %v1376_v54 = vld [vmem:[%s2393_s1 + $0x198] sm:$0xf0]  ;;  %v1315_v58 = vor.u32 %v1627_v51, %v1312_v52  ;;  %v1628_v59 = vld [vmem:[%s2393_s1 + $0x114] sm:$0xf0]  ;;  %v1374_v60 = vld [vmem:[%s2393_s1 + $0x190] sm:$0xf] }
  0x35   : > { %667 = vmatpush.bf16.msrb.mxu1 %v1415_v1  ;;  %v1644_v61 = vld [vmem:[%s2393_s1 + $0x194] sm:$0xf0]  ;;  %v1379_v62 = vor.u32 %v1643_v53, %v1376_v54  ;;  %v1625_v63 = vld [vmem:[%s2393_s1 + $0x104] sm:$0xf]  ;;  %v1304_v0 = vld [vmem:[%s2393_s1 + $0x108] sm:$0xf0]  ;;  %v1311_v5 = vor.u32 %v1628_v59, %v1310_v56 }
  0x36   : > { %v1641_v1 = vld [vmem:[%s2393_s1 + $0x184] sm:$0xf]  ;;  %v1671_v3 = vld [vmem:[%s2393_s1 + $0x274] sm:$0xf]  ;;  %v1520_v4 = vld [vmem:[%s2393_s1 + $0x278] sm:$0xf0]  ;;  %v1375_v9 = vor.u32 %v1644_v61, %v1374_v60  ;;  %v1307_v10 = vor.u32 %v1625_v63, %v1304_v0 }
  0x37   : > { %686 = vmatpush.bf16.msrb.mxu2 %v1347_v2  ;;  %v1368_v2 = vld [vmem:[%s2393_s1 + $0x188] sm:$0xf0]  ;;  %v1687_v7 = vld [vmem:[%s2393_s1 + $0x2f4] sm:$0xf]  ;;  %v1584_v8 = vld [vmem:[%s2393_s1 + $0x2f8] sm:$0xf0] }
  0x38   : > { %704 = vmatpush.bf16.msrb.mxu3 %v1411_v6  ;;  %650 = vmatpush.bf16.msrb.mxu0 %v1343_v13  ;;  %v1302_v6 = vld [vmem:[%s2393_s1 + $0x100] sm:$0xf]  ;;  %v1626_v11 = vld [vmem:[%s2393_s1 + $0x104] sm:$0xf0]  ;;  %v1518_v16 = vld [vmem:[%s2393_s1 + $0x270] sm:$0xf] }
  0x39   : > { %668 = vmatpush.bf16.msrb.mxu1 %v1407_v14  ;;  %v1366_v12 = vld [vmem:[%s2393_s1 + $0x180] sm:$0xf]  ;;  %v1642_v13 = vld [vmem:[%s2393_s1 + $0x184] sm:$0xf0]  ;;  %v1371_v14 = vor.u32 %v1641_v1, %v1368_v2  ;;  %v1672_v17 = vld [vmem:[%s2393_s1 + $0x274] sm:$0xf0]  ;;  %v1303_v23 = vor.u32 %v1626_v11, %v1302_v6 }
  0x3a   : > { %v1582_v18 = vld [vmem:[%s2393_s1 + $0x2f0] sm:$0xf]  ;;  %v1688_v20 = vld [vmem:[%s2393_s1 + $0x2f4] sm:$0xf0]  ;;  %v1669_v21 = vld [vmem:[%s2393_s1 + $0x264] sm:$0xf]  ;;  %v1367_v24 = vor.u32 %v1642_v13, %v1366_v12  ;;  %v1519_v25 = vor.u32 %v1672_v17, %v1518_v16 }
  0x3b   : > { %687 = vmatpush.bf16.msrb.mxu2 %v1339_v15  ;;  %v1523_v15 = vor.u32 %v1671_v3, %v1520_v4  ;;  %v1512_v22 = vld [vmem:[%s2393_s1 + $0x268] sm:$0xf0]  ;;  %v1685_v26 = vld [vmem:[%s2393_s1 + $0x2e4] sm:$0xf]  ;;  %v1510_v30 = vld [vmem:[%s2393_s1 + $0x260] sm:$0xf] }
  0x3c   : > { %705 = vmatpush.bf16.msrb.mxu3 %v1403_v19  ;;  %651 = vmatpush.bf16.msrb.mxu0 %v1335_v27  ;;  %v1587_v19 = vor.u32 %v1687_v7, %v1584_v8  ;;  %v1576_v27 = vld [vmem:[%s2393_s1 + $0x2e8] sm:$0xf0]  ;;  %v1670_v31 = vld [vmem:[%s2393_s1 + $0x264] sm:$0xf0]  ;;  %v1574_v32 = vld [vmem:[%s2393_s1 + $0x2e0] sm:$0xf] }
  0x3d   : > { %669 = vmatpush.bf16.msrb.mxu1 %v1399_v28  ;;  %396 = vmatmul.bf16.gmra.mxu0 %v2068_v33  ;;  %v1583_v28 = vor.u32 %v1688_v20, %v1582_v18  ;;  %v1667_v35 = vld [vmem:[%s2393_s1 + $0x254] sm:$0xf]  ;;  %v1504_v36 = vld [vmem:[%s2393_s1 + $0x258] sm:$0xf0]  ;;  %v1579_v37 = vor.u32 %v1685_v26, %v1576_v27  ;;  %v1511_v39 = vor.u32 %v1670_v31, %v1510_v30  ;;  %v1502_v45 = vld [vmem:[%s2393_s1 + $0x250] sm:$0xf] }
  0x3e   : > { %413 = vmatmul.bf16.gmra.mxu1 %v2079_v38  ;;  %430 = vmatmul.bf16.gmra.mxu2 %v2068_v33  ;;  %v1683_v40 = vld [vmem:[%s2393_s1 + $0x2d4] sm:$0xf]  ;;  %v1668_v46 = vld [vmem:[%s2393_s1 + $0x254] sm:$0xf0]  ;;  %v1566_v47 = vld [vmem:[%s2393_s1 + $0x2d0] sm:$0xf] }
  0x3f   : > { %688 = vmatpush.bf16.msrb.mxu2 %v1331_v29  ;;  %447 = vmatmul.bf16.gmra.mxu3 %v2079_v38  ;;  %v1515_v29 = vor.u32 %v1669_v21, %v1512_v22  ;;  %v1665_v50 = vld [vmem:[%s2393_s1 + $0x244] sm:$0xf]  ;;  %v1496_v51 = vld [vmem:[%s2393_s1 + $0x248] sm:$0xf0]  ;;  %v1503_v53 = vor.u32 %v1668_v46, %v1502_v45  ;;  %v1666_v59 = vld [vmem:[%s2393_s1 + $0x244] sm:$0xf0] }
  0x40   : > { %706 = vmatpush.bf16.msrb.mxu3 %v1395_v34  ;;  %652 = vmatpush.bf16.msrb.mxu0 %v1327_v41  ;;  %v1686_v34 = vld [vmem:[%s2393_s1 + $0x2e4] sm:$0xf0]  ;;  %v1568_v41 = vld [vmem:[%s2393_s1 + $0x2d8] sm:$0xf0]  ;;  %v1681_v54 = vld [vmem:[%s2393_s1 + $0x2c4] sm:$0xf] }
  0x41   : > { %670 = vmatpush.bf16.msrb.mxu1 %v1391_v42  ;;  %v1575_v42 = vor.u32 %v1686_v34, %v1574_v32  ;;  %v1571_v52 = vor.u32 %v1683_v40, %v1568_v41  ;;  %v1558_v60 = vld [vmem:[%s2393_s1 + $0x2c0] sm:$0xf]  ;;  %v1682_v61 = vld [vmem:[%s2393_s1 + $0x2c4] sm:$0xf0]  ;;  %v1488_v63 = vld [vmem:[%s2393_s1 + $0x238] sm:$0xf0] }
  0x42   : > { %v1679_v2 = vld [vmem:[%s2393_s1 + $0x2b4] sm:$0xf]  ;;  %v1552_v3 = vld [vmem:[%s2393_s1 + $0x2b8] sm:$0xf0]  ;;  %v1559_v4 = vor.u32 %v1682_v61, %v1558_v60  ;;  %v1486_v6 = vld [vmem:[%s2393_s1 + $0x230] sm:$0xf] }
  0x43   : > { %689 = vmatpush.bf16.msrb.mxu2 %v1323_v43  ;;  %v1507_v43 = vor.u32 %v1667_v35, %v1504_v36  ;;  %v1664_v7 = vld [vmem:[%s2393_s1 + $0x234] sm:$0xf0]  ;;  %v1550_v8 = vld [vmem:[%s2393_s1 + $0x2b0] sm:$0xf]  ;;  %v1480_v11 = vld [vmem:[%s2393_s1 + $0x228] sm:$0xf0]  ;;  %v1555_v12 = vor.u32 %v1679_v2, %v1552_v3 }
  0x44   : > { %707 = vmatpush.bf16.msrb.mxu3 %v1387_v48  ;;  %653 = vmatpush.bf16.msrb.mxu0 %v1319_v55  ;;  %v1684_v48 = vld [vmem:[%s2393_s1 + $0x2d4] sm:$0xf0]  ;;  %v1560_v55 = vld [vmem:[%s2393_s1 + $0x2c8] sm:$0xf0]  ;;  %v1487_v13 = vor.u32 %v1664_v7, %v1486_v6  ;;  %v1478_v18 = vld [vmem:[%s2393_s1 + $0x220] sm:$0xf] }
  0x45   : > { %671 = vmatpush.bf16.msrb.mxu1 %v1383_v57  ;;  %v1567_v56 = vor.u32 %v1684_v48, %v1566_v47  ;;  %v1499_v57 = vor.u32 %v1665_v50, %v1496_v51  ;;  %v1563_v0 = vor.u32 %v1681_v54, %v1560_v55  ;;  %v1542_v20 = vld [vmem:[%s2393_s1 + $0x2a0] sm:$0xf]  ;;  %v1678_v21 = vld [vmem:[%s2393_s1 + $0x2a4] sm:$0xf0]  ;;  %v1659_v22 = vld [vmem:[%s2393_s1 + $0x214] sm:$0xf] }
  0x46   : > { %v1675_v26 = vld [vmem:[%s2393_s1 + $0x294] sm:$0xf]  ;;  %v1536_v27 = vld [vmem:[%s2393_s1 + $0x298] sm:$0xf0]  ;;  %v1470_v30 = vld [vmem:[%s2393_s1 + $0x210] sm:$0xf] }
  0x47   : > { %690 = vmatpush.bf16.msrb.mxu2 %v1315_v58  ;;  %v1494_v58 = vld [vmem:[%s2393_s1 + $0x240] sm:$0xf]  ;;  %v1660_v31 = vld [vmem:[%s2393_s1 + $0x214] sm:$0xf0]  ;;  %v1534_v32 = vld [vmem:[%s2393_s1 + $0x290] sm:$0xf] }
  0x48   : > { %708 = vmatpush.bf16.msrb.mxu3 %v1379_v62  ;;  %654 = vmatpush.bf16.msrb.mxu0 %v1311_v5  ;;  %v1663_v62 = vld [vmem:[%s2393_s1 + $0x234] sm:$0xf]  ;;  %v1495_v1 = vor.u32 %v1666_v59, %v1494_v58  ;;  %v1676_v34 = vld [vmem:[%s2393_s1 + $0x294] sm:$0xf0]  ;;  %v1657_v35 = vld [vmem:[%s2393_s1 + $0x204] sm:$0xf] }
  0x49   : > { %672 = vmatpush.bf16.msrb.mxu1 %v1375_v9  ;;  %v1491_v5 = vor.u32 %v1663_v62, %v1488_v63  ;;  %v1680_v9 = vld [vmem:[%s2393_s1 + $0x2b4] sm:$0xf0]  ;;  %v1464_v36 = vld [vmem:[%s2393_s1 + $0x208] sm:$0xf0]  ;;  %v1673_v40 = vld [vmem:[%s2393_s1 + $0x284] sm:$0xf]  ;;  %v1535_v41 = vor.u32 %v1676_v34, %v1534_v32 }
  0x4a   : > { %v1551_v16 = vor.u32 %v1680_v9, %v1550_v8  ;;  %v1462_v45 = vld [vmem:[%s2393_s1 + $0x200] sm:$0xf]  ;;  %v1658_v46 = vld [vmem:[%s2393_s1 + $0x204] sm:$0xf0]  ;;  %s1590_s4 = sshll.u32 %s2397_s13, 5 }
  0x4b   : > { %691 = vmatpush.bf16.msrb.mxu2 %v1307_v10  ;;  %v1661_v10 = vld [vmem:[%s2393_s1 + $0x224] sm:$0xf]  ;;  %v1526_v47 = vld [vmem:[%s2393_s1 + $0x280] sm:$0xf]  ;;  %v1674_v48 = vld [vmem:[%s2393_s1 + $0x284] sm:$0xf0]  ;;  %v1463_v51 = vor.u32 %v1658_v46, %v1462_v45  ;;  %s2375_s7 = scalar_lea.vmem %s2395_s3, %s1590_s4 }
  0x4c   : > { %709 = vmatpush.bf16.msrb.mxu3 %v1371_v14  ;;  %655 = vmatpush.bf16.msrb.mxu0 %v1303_v23  ;;  %v1677_v14 = vld [vmem:[%s2393_s1 + $0x2a4] sm:$0xf]  ;;  %v1483_v17 = vor.u32 %v1661_v10, %v1480_v11  ;;  %v1472_v23 = vld [vmem:[%s2393_s1 + $0x218] sm:$0xf0] }
  0x4d   : > { %673 = vmatpush.bf16.msrb.mxu1 %v1367_v24 }
  0x4e   : > { %692 = vmatmul.bf16.vlgmr.msrb.gmra.mxu2 %v1963_v44 }
  0x4f   : > { %982 = vmatpush.bf16.msra.mxu2 %v1523_v15  ;;  %656 = vmatmul.bf16.vlgmr.msrb.gmra.mxu0 %v1963_v44  ;;  %v1544_v15 = vld [vmem:[%s2393_s1 + $0x2a8] sm:$0xf0] }
  0x50   : > { %1000 = vmatpush.bf16.msra.mxu3 %v1587_v19  ;;  %946 = vmatpush.bf16.msra.mxu0 %v1519_v25  ;;  %v1662_v19 = vld [vmem:[%s2393_s1 + $0x224] sm:$0xf0]  ;;  %v1547_v24 = vor.u32 %v1677_v14, %v1544_v15 }
  0x51   : > { %964 = vmatpush.bf16.msra.mxu1 %v1583_v28  ;;  %710 = vmatmul.bf16.vlgmr.msrb.gmra.mxu3 %v1974_v49  ;;  %v1479_v25 = vor.u32 %v1662_v19, %v1478_v18  ;;  %v1543_v28 = vor.u32 %v1678_v21, %v1542_v20 }
  0x52   : > { %674 = vmatmul.bf16.vlgmr.msrb.gmra.mxu1 %v1974_v49 }
  0x53   : > { %983 = vmatpush.bf16.msra.mxu2 %v1515_v29  ;;  %v1475_v29 = vor.u32 %v1659_v22, %v1472_v23 }
  0x54   : > { %1001 = vmatpush.bf16.msra.mxu3 %v1579_v37  ;;  %947 = vmatpush.bf16.msra.mxu0 %v1511_v39  ;;  %v1539_v37 = vor.u32 %v1675_v26, %v1536_v27  ;;  %v1471_v39 = vor.u32 %v1660_v31, %v1470_v30 }
  0x55   : > { %965 = vmatpush.bf16.msra.mxu1 %v1575_v42  ;;  %v1467_v42 = vor.u32 %v1657_v35, %v1464_v36 }
  0x57   : > { %984 = vmatpush.bf16.msra.mxu2 %v1507_v43  ;;  %v1528_v43 = vld [vmem:[%s2393_s1 + $0x288] sm:$0xf0] }
  0x58   : > { %1002 = vmatpush.bf16.msra.mxu3 %v1571_v52  ;;  %948 = vmatpush.bf16.msra.mxu0 %v1503_v53  ;;  %v1531_v50 = vor.u32 %v1673_v40, %v1528_v43  ;;  %v1527_v52 = vor.u32 %v1674_v48, %v1526_v47 }
  0x59   : > { %966 = vmatpush.bf16.msra.mxu1 %v1567_v56 }
  0x5b   : > { %985 = vmatpush.bf16.msra.mxu2 %v1499_v57 }
  0x5c   : > { %1003 = vmatpush.bf16.msra.mxu3 %v1563_v0  ;;  %949 = vmatpush.bf16.msra.mxu0 %v1495_v1 }
  0x5d   : > { %967 = vmatpush.bf16.msra.mxu1 %v1559_v4 }
  0x5e   : > { %697 = vmatmul.bf16.gmra.mxu2 %v2068_v33 }
  0x5f   : > { %986 = vmatpush.bf16.msra.mxu2 %v1491_v5  ;;  %661 = vmatmul.bf16.gmra.mxu0 %v2068_v33 }
  0x60   : > { %1004 = vmatpush.bf16.msra.mxu3 %v1555_v12  ;;  %950 = vmatpush.bf16.msra.mxu0 %v1487_v13 }
  0x61   : > { %968 = vmatpush.bf16.msra.mxu1 %v1551_v16  ;;  %715 = vmatmul.bf16.gmra.mxu3 %v2079_v38 }
  0x62   : > { %679 = vmatmul.bf16.gmra.mxu1 %v2079_v38 }
  0x63   : > { %987 = vmatpush.bf16.msra.mxu2 %v1483_v17 }
  0x64   : > { %1005 = vmatpush.bf16.msra.mxu3 %v1547_v24  ;;  %951 = vmatpush.bf16.msra.mxu0 %v1479_v25 }
  0x65   : > { %969 = vmatpush.bf16.msra.mxu1 %v1543_v28 }
  0x67   : > { %988 = vmatpush.bf16.msra.mxu2 %v1475_v29 }
  0x68   : > { %1006 = vmatpush.bf16.msra.mxu3 %v1539_v37  ;;  %952 = vmatpush.bf16.msra.mxu0 %v1471_v39  ;;  %v1055_v39 = vld [vmem:[%s2394_s2] sm:$0x3] }
  0x69   : > { %970 = vmatpush.bf16.msra.mxu1 %v1535_v41  ;;  %v1057_v45 = vperm.slane %v1055_v39, 0 }
  0x6b   : > { %989 = vmatpush.bf16.msra.mxu2 %v1467_v42 }
  0x6c   : > { %1007 = vmatpush.bf16.msra.mxu3 %v1531_v50  ;;  %953 = vmatpush.bf16.msra.mxu0 %v1463_v51 }
  0x6d   : > { %971 = vmatpush.bf16.msra.mxu1 %v1527_v52 }
  0x6e   : > { %990 = vmatmul.bf16.vlgmr.msra.gmra.mxu2 %v1963_v44 }
  0x6f   : > { %954 = vmatmul.bf16.vlgmr.msra.gmra.mxu0 %v1963_v44 }
  0x71   : > { %1008 = vmatmul.bf16.vlgmr.msra.gmra.mxu3 %v1974_v49 }
  0x72   : > { %972 = vmatmul.bf16.vlgmr.msra.gmra.mxu1 %v1974_v49 }
  0x7e   : > { %995 = vmatmul.bf16.gmra.mxu2 %v2068_v33 }
  0x7f   : > { %959 = vmatmul.bf16.gmra.mxu0 %v2068_v33 }
  0x81   : > { %1013 = vmatmul.bf16.gmra.mxu3 %v2079_v38 }
  0x82   : > { %977 = vmatmul.bf16.gmra.mxu1 %v2079_v38 }
  0xaa   : > { %v392_v53 = vpop.f32.mrf.mxu0 }
  0xab   : > { %v409_v54 = vpop.f32.mrf.mxu1 }
  0xac   : > { %v410_v55 = vadd.f32 %v409_v54, %v392_v53 }
  0xb1   : > { %v426_v56 = vpop.f32.mrf.mxu2 }
  0xb2   : > { %v443_v57 = vpop.f32.mrf.mxu3  ;;  %v394_v58 = vpop.f32.mrf.mxu0 }
  0xb3   : > { %v2359_v59 = vadd.f32 %v443_v57, %v426_v56  ;;  %v411_v44 = vpop.f32.mrf.mxu1 }
  0xb4   : > { %v2361_v60 = vadd.f32 %v411_v44, %v394_v58 }
  0xb9   : > { %v428_v49 = vpop.f32.mrf.mxu2 }
  0xba   : > { %v445_v61 = vpop.f32.mrf.mxu3  ;;  %v397_v62 = vpop.f32.mrf.mxu0 }
  0xbb   : > { %v2363_v63 = vadd.f32 %v445_v61, %v428_v49  ;;  %v414_v33 = vpop.f32.mrf.mxu1 }
  0xc1   : > { %v431_v0 = vpop.f32.mrf.mxu2 }
  0xc2   : > { %v448_v1 = vpop.f32.mrf.mxu3  ;;  %v398_v38 = vpop.f32.mrf.mxu0 }
  0xc3   : > { %v415_v2 = vpop.f32.mrf.mxu1  ;;  %v1058_v1 = vperm.slane %v1055_v39, 1 }
  0xc9   : > { %v432_v3 = vpop.f32.mrf.mxu2 }
  0xca   : > { %v449_v4 = vpop.f32.mrf.mxu3 }
  0xcc   : > { %v657_v5 = vpop.f32.mrf.mxu0 }
  0xcf   : > { %v675_v6 = vpop.f32.mrf.mxu1 }
  0xd0   : > { %v676_v24 = vadd.f32 %v675_v6, %v657_v5 }
  0xd1   : > { %v693_v7 = vpop.f32.mrf.mxu2 }
  0xd2   : > { %v731_v28 = vrot.slane %v676_v24, 1 }
  0xd4   : > { %v711_v8 = vpop.f32.mrf.mxu3  ;;  %v659_v9 = vpop.f32.mrf.mxu0 }
  0xd5   : > { %v712_v34 = vadd.f32 %v711_v8, %v693_v7 }
  0xd7   : > { %v677_v10 = vpop.f32.mrf.mxu1  ;;  %v734_v46 = vrot.slane %v712_v34, 1 }
  0xd8   : > { %v678_v23 = vadd.f32 %v677_v10, %v659_v9 }
  0xd9   : > { %v695_v11 = vpop.f32.mrf.mxu2 }
  0xda   : > { %v732_v25 = vrot.slane %v678_v23, 1 }
  0xdc   : > { %v713_v12 = vpop.f32.mrf.mxu3  ;;  %v662_v13 = vpop.f32.mrf.mxu0  ;;  %v733_v35 = vsel %vm730_vm0, %v731_v28, %v732_v25 }
  0xdd   : > { %v714_v29 = vadd.f32 %v713_v12, %v695_v11  ;;  %v745_v43 = vadd.f32 %v733_v35, %v410_v55 }
  0xdf   : > { %v680_v14 = vpop.f32.mrf.mxu1  ;;  %v735_v40 = vrot.slane %v714_v29, 1 }
  0xe0   : > { %v681_v36 = vadd.f32 %v680_v14, %v662_v13 }
  0xe1   : > { %v698_v15 = vpop.f32.mrf.mxu2  ;;  %v736_v54 = vsel %vm730_vm0, %v734_v46, %v735_v40 }
  0xe2   : > { %v737_v47 = vrot.slane %v681_v36, 1  ;;  %v746_v0 = vadd.f32 %v736_v54, %v2359_v59 }
  0xe4   : > { %v716_v16 = vpop.f32.mrf.mxu3  ;;  %v664_v17 = vpop.f32.mrf.mxu0  ;;  %v738_v49 = vsel %vm730_vm0, %v732_v25, %v737_v47 }
  0xe5   : > { %v717_v56 = vadd.f32 %v716_v16, %v698_v15  ;;  %v747_v4 = vadd.f32 %v738_v49, %v2361_v60 }
  0xe7   : > { %v682_v18 = vpop.f32.mrf.mxu1  ;;  %v739_v38 = vrot.slane %v717_v56, 1 }
  0xe9   : > { %v700_v19 = vpop.f32.mrf.mxu2  ;;  %v740_v59 = vsel %vm730_vm0, %v735_v40, %v739_v38 }
  0xea   : > { %v748_v16 = vadd.f32 %v740_v59, %v2363_v63 }
  0xec   : > { %v718_v20 = vpop.f32.mrf.mxu3  ;;  %v955_v21 = vpop.f32.mrf.mxu0 }
  0xef   : > { %v973_v22 = vpop.f32.mrf.mxu1 }
  0xf0   : > { %v974_v30 = vadd.f32 %v973_v22, %v955_v21 }
  0xf1   : > { %v991_v26 = vpop.f32.mrf.mxu2 }
  0xf2   : > { %v1029_v41 = vrot.slane %v974_v30, 2 }
  0xf4   : > { %v1009_v27 = vpop.f32.mrf.mxu3  ;;  %v957_v31 = vpop.f32.mrf.mxu0 }
  0xf5   : > { %v1010_v48 = vadd.f32 %v1009_v27, %v991_v26 }
  0xf7   : > { %v975_v32 = vpop.f32.mrf.mxu1  ;;  %v1032_v61 = vrot.slane %v1010_v48, 2 }
  0xf8   : > { %v976_v37 = vadd.f32 %v975_v32, %v957_v31 }
  0xf9   : > { %v993_v51 = vpop.f32.mrf.mxu2 }
  0xfa   : > { %v1030_v42 = vrot.slane %v976_v37, 2 }
  0xfc   : > { %v1031_v50 = vsel %vm1028_vm1, %v1029_v41, %v1030_v42  ;;  %v1011_v53 = vpop.f32.mrf.mxu3  ;;  %v960_v57 = vpop.f32.mrf.mxu0 }
  0xfd   : > { %v1043_v52 = vadd.f32 %v1031_v50, %v745_v43  ;;  %v1012_v55 = vadd.f32 %v1011_v53, %v993_v51 }
  0xff   : > { %v1061_v58 = vadd.f32 %v1057_v45, %v1043_v52  ;;  %v978_v44 = vpop.f32.mrf.mxu1  ;;  %v1033_v62 = vrot.slane %v1012_v55, 2 }
 0x100   : > { %v979_v33 = vadd.f32 %v978_v44, %v960_v57 }
 0x101   : > { %1065 = vst [vmem:[%s2375_s7] sm:$0xff] %v1061_v58  ;;  %v1034_v2 = vsel %vm1028_vm1, %v1032_v61, %v1033_v62  ;;  %v996_v7 = vpop.f32.mrf.mxu2 }
 0x102   : > { %v1035_v3 = vrot.slane %v979_v33, 2  ;;  %v1044_v5 = vadd.f32 %v1034_v2, %v746_v0 }
 0x104   : > { %v1036_v6 = vsel %vm1028_vm1, %v1030_v42, %v1035_v3  ;;  %v1062_v8 = vadd.f32 %v1058_v1, %v1044_v5  ;;  %v1014_v10 = vpop.f32.mrf.mxu3  ;;  %v962_v12 = vpop.f32.mrf.mxu0 }
 0x105   : > { %v1045_v9 = vadd.f32 %v1036_v6, %v747_v4  ;;  %v1015_v11 = vadd.f32 %v1014_v10, %v996_v7 }
 0x106   : > { %1066 = vst [vmem:[%s2375_s7 + $0x8] sm:$0xff] %v1062_v8 }
 0x107   : > { %v1063_v13 = vadd.f32 %v1057_v45, %v1045_v9  ;;  %v980_v14 = vpop.f32.mrf.mxu1  ;;  %v1037_v15 = vrot.slane %v1015_v11, 2 }
 0x109   : > { %1067 = vst [vmem:[%s2375_s7 + $0x10] sm:$0xff] %v1063_v13  ;;  %v1038_v60 = vsel %vm1028_vm1, %v1033_v62, %v1037_v15  ;;  %v998_v18 = vpop.f32.mrf.mxu2 }
 0x10a   : > { %v1046_v17 = vadd.f32 %v1038_v60, %v748_v16 }
 0x10c   : > { %v1064_v19 = vadd.f32 %v1058_v1, %v1046_v17  ;;  %v1016_v20 = vpop.f32.mrf.mxu3 }
 0x10e   : > { %1068 = vst [vmem:[%s2375_s7 + $0x18] sm:$0xff] %v1064_v19 }
 0x10f PF: > { %s13_s12 = sadd.s32 1, %s1704_s12  }
 0x110   : > { %p10_p4 = scmp.ge.s32.totalorder %s13_s12, 4  }
 0x112   :  { %12 = sbr.rel (!%p10_p4) target bundleno = 1 (0x1), region = 64 }

</bundles_post_ra>
